<compile_context>
chip_gen: v7x
topology: tpu7x:2x2x1
jax: 0.10.0
libtpu: 0.0.40
codegen_flags: <defaults>
</compile_context>

<pallas_src>
import functools

import jax
import jax.numpy as jnp
import numpy as np
from jax.experimental import pallas as pl
from jax.experimental.pallas import tpu as pltpu


_LANE = 128                            # lane width / channel padding
_NODE_PAD = 256                        # node padding granularity (decoupled from TK)
_H_RESIDENT_BYTES = 8 * 1024 * 1024    # keep h fully VMEM-resident below this size
_VMEM_LIMIT = 48 * 1024 * 1024         # v7x-safe (64 MiB physical) with headroom


def _round_up(x, m):
    return ((x + m - 1) // m) * m


def _pick_tile(n, candidates):
    """Largest candidate tile that divides n (n is always a multiple of 256)."""
    for c in candidates:
        if n % c == 0:
            return c
    return n


# ------------- kernel A: h_s = nf * tanh(z @ W^T + x @ U^T + b) ----------------

def _h_kernel(z_ref, x_ref, wt_ref, ut_ref, b_ref, nf_ref, h_ref):
    cdt = wt_ref.dtype
    acc = jnp.dot(z_ref[...].astype(cdt), wt_ref[...],
                  preferred_element_type=jnp.float32)
    acc = acc + jnp.dot(x_ref[...], ut_ref[...],
                        preferred_element_type=jnp.float32)
    acc = acc + b_ref[...]
    # Column-side symmetric normalization fused here, in f32, before the narrowing
    # cast. Padded rows have nf == 0 -> padded h rows are exactly zero.
    h_ref[...] = (nf_ref[...] * jnp.tanh(acc)).astype(h_ref.dtype)


def _h_pallas(z, x, wt, ut, b, nf_col, tm):
    np_, hp = z.shape
    mp = wt.shape[1]
    grid = (np_ // tm,)
    return pl.pallas_call(
        _h_kernel,
        out_shape=jax.ShapeDtypeStruct((np_, mp), wt.dtype),
        grid_spec=pltpu.PrefetchScalarGridSpec(
            num_scalar_prefetch=0,
            grid=grid,
            in_specs=[
                pl.BlockSpec((tm, hp), lambda i: (i, 0)),   # z rows (f32)
                pl.BlockSpec((tm, hp), lambda i: (i, 0)),   # x rows (compute dtype)
                pl.BlockSpec((hp, mp), lambda i: (0, 0)),   # W^T (resident)
                pl.BlockSpec((hp, mp), lambda i: (0, 0)),   # U^T (resident)
                pl.BlockSpec((1, mp), lambda i: (0, 0)),    # folded bias bW+bU (f32)
                pl.BlockSpec((tm, 1), lambda i: (i, 0)),    # nf rows (f32)
            ],
            out_specs=pl.BlockSpec((tm, mp), lambda i: (i, 0)),
        ),
        compiler_params=pltpu.CompilerParams(
            dimension_semantics=("parallel",),
            vmem_limit_bytes=_VMEM_LIMIT),
    )(z, x, wt, ut, b, nf_col)


# -- kernel B: p += A @ h_s ; last K step: out = (1-a)*z + a*((nf*p) @ W) -------

def _prop_kernel(adj_ref, h_ref, z_ref, nf_ref, w_ref, out_ref, p_acc,
                 *, alpha, tk, h_resident):
    k = pl.program_id(1)

    @pl.when(k == 0)
    def _():
        p_acc[...] = jnp.zeros_like(p_acc)

    cdt = w_ref.dtype
    adj = adj_ref[...].astype(cdt)             # exact int8 {0,1} -> MXU dtype (VPU cast)
    if h_resident:
        off = pl.multiple_of(k * tk, tk)
        h_blk = h_ref[pl.ds(off, tk), :]       # h fully VMEM-resident, slice per k step
    else:
        h_blk = h_ref[...]                     # streamed (tk, Mp) block
    p_acc[...] += jnp.dot(adj, h_blk, preferred_element_type=jnp.float32)

    @pl.when(k == pl.num_programs(1) - 1)
    def _():
        p = p_acc[...] * nf_ref[...]           # row-side nf applied in f32
        new_z = jnp.dot(p.astype(cdt), w_ref[...],
                        preferred_element_type=jnp.float32)
        out_ref[...] = ((1.0 - alpha) * z_ref[...]
                        + alpha * new_z).astype(out_ref.dtype)


def _prop_pallas(adj, h, z, nf_col, w, alpha, tm, tk):
    np_ = adj.shape[0]
    mp = h.shape[1]
    hp = w.shape[1]
    grid = (np_ // tm, np_ // tk)

    h_bytes = np_ * mp * h.dtype.itemsize
    h_resident = h_bytes <= _H_RESIDENT_BYTES
    if h_resident:
        h_spec = pl.BlockSpec((np_, mp), lambda i, k: (0, 0))   # fetched once
    else:
        h_spec = pl.BlockSpec((tk, mp), lambda i, k: (k, 0))    # streamed fallback

    kernel = functools.partial(_prop_kernel, alpha=float(alpha), tk=tk,
                               h_resident=h_resident)
    return pl.pallas_call(
        kernel,
        out_shape=jax.ShapeDtypeStruct((np_, hp), z.dtype),
        grid_spec=pltpu.PrefetchScalarGridSpec(
            num_scalar_prefetch=0,
            grid=grid,
            in_specs=[
                pl.BlockSpec((tm, tk), lambda i, k: (i, k)),   # int8 adjacency tile
                h_spec,                                        # h (resident or streamed)
                pl.BlockSpec((tm, hp), lambda i, k: (i, 0)),   # z rows (f32, blend)
                pl.BlockSpec((tm, 1), lambda i, k: (i, 0)),    # nf rows (f32)
                pl.BlockSpec((mp, hp), lambda i, k: (0, 0)),   # W (resident)
            ],
            out_specs=pl.BlockSpec((tm, hp), lambda i, k: (i, 0)),
            scratch_shapes=[pltpu.VMEM((tm, mp), jnp.float32)],  # f32 p accumulator
        ),
        input_output_aliases={2: 0},    # blend z in place (z is not reused by callers)
        compiler_params=pltpu.CompilerParams(
            dimension_semantics=("parallel", "arbitrary"),
            vmem_limit_bytes=_VMEM_LIMIT),
    )(adj, h, z, nf_col, w)


# ----------------------------- Module wrapper ---------------------------------

class ImplicitModulePallas:
    """Pallas analogue of Implicit_Module: a list of Implicit_Func layers."""

    def __init__(self, hidden_channel, middle_channels, alpha, key):
        self.alpha = float(alpha)
        self.hidden_channel = int(hidden_channel)
        self.params = []  # f32 master weights (nn.Linear-style init)
        for li, mc in enumerate(middle_channels):
            k = jax.random.fold_in(key, li)
            kw, kbw, ku, kbu = jax.random.split(k, 4)
            bound = 1.0 / np.sqrt(hidden_channel)
            W = jax.random.uniform(kw, (mc, hidden_channel), jnp.float32, -bound, bound)
            bW = jax.random.uniform(kbw, (1, mc), jnp.float32, -bound, bound)
            U = jax.random.uniform(ku, (mc, hidden_channel), jnp.float32, -bound, bound)
            bU = jax.random.uniform(kbu, (1, mc), jnp.float32, -bound, bound)
            self.params.append((W, bW, U, bU))
        self._padded_cache = {}

    # pad channels to 128 lanes, pre-transpose, cast to the MXU compute dtype,
    # and fold the two biases into one. Cached per compute dtype.
    def _padded_params(self, compute_dtype):
        key = np.dtype(compute_dtype).name
        if key in self._padded_cache:
            return self._padded_cache[key]
        H = self.hidden_channel
        Hp = _round_up(H, _LANE)
        out = []
        for (W, bW, U, bU) in self.params:
            mc = W.shape[0]
            Mp = _round_up(mc, _LANE)
            WT = jnp.zeros((Hp, Mp), compute_dtype).at[:H, :mc].set(W.T.astype(compute_dtype))
            UT = jnp.zeros((Hp, Mp), compute_dtype).at[:H, :mc].set(U.T.astype(compute_dtype))
            Wp = jnp.zeros((Mp, Hp), compute_dtype).at[:mc, :H].set(W.astype(compute_dtype))
            b = jnp.zeros((1, Mp), jnp.float32).at[:, :mc].set(bW + bU)
            out.append((WT, UT, Wp, b))
        self._padded_cache[key] = out
        return out

    def build_adjacency(self, edge_index, num_nodes):
        """Dense {0,1} adjacency, exact int8, padded to _NODE_PAD.
        Build once per graph and reuse across layers and forward calls."""
        N = int(num_nodes)
        Np = _round_up(N, _NODE_PAD)
        src, dst = edge_index[0], edge_index[1]
        ones = jnp.ones(src.shape, jnp.int8)
        return jnp.zeros((Np, Np), jnp.int8).at[dst, src].add(ones)

    def forward(self, z, x, edge_index, norm_factor, batch=None,
                compute_dtype=jnp.bfloat16, adj=None):
        del batch  # norm(.., batch) is identity in eval mode
        N, H = x.shape
        Np = _round_up(N, _NODE_PAD)
        Hp = _round_up(H, _LANE)

        if adj is None:  # callers should prebuild & reuse via build_adjacency()
            adj = self.build_adjacency(edge_index, N)

        nf = norm_factor.reshape(-1).astype(jnp.float32)
        nf_col = jnp.zeros((Np, 1), jnp.float32).at[:N, 0].set(nf)

        z_p = jnp.zeros((Np, Hp), jnp.float32).at[:N, :H].set(z.astype(jnp.float32))
        x_p = jnp.zeros((Np, Hp), jnp.float32).at[:N, :H].set(x.astype(jnp.float32))
        x_p = x_p.astype(compute_dtype)

        tm_h = _pick_tile(Np, (1024, 512, 256))         # kernel A row tile
        tm_p = _pick_tile(Np, (512, 256))               # kernel B row tile
        tk_p = _pick_tile(Np, (2048, 1024, 512, 256))   # kernel B reduction tile

        for (WT, UT, Wp, b) in self._padded_params(compute_dtype):
            h = _h_pallas(z_p, x_p, WT, UT, b, nf_col, tm_h)            # (Np, Mp)
            z_p = _prop_pallas(adj, h, z_p, nf_col, Wp, self.alpha,     # (Np, Hp) f32
                               tm_p, tk_p)
        return z_p[:N, :H]

    # pure-JAX f32 reference for validation
    def forward_ref(self, z, x, edge_index, norm_factor, batch=None):
        n = x.shape[0]
        src, dst = edge_index[0], edge_index[1]
        A = jnp.zeros((n, n), jnp.float32).at[dst, src].add(1.0)
        nf = norm_factor.astype(jnp.float32)
        for (W, bW, U, bU) in self.params:
            h = jnp.tanh(z @ W.T + bW + x @ U.T + bU)
            p = nf * (A @ (nf * h))
            z = (1.0 - self.alpha) * z + self.alpha * (p @ W)
        return z


# ----------------------------------- main --------------------------------------

if __name__ == "__main__":
    key = jax.random.PRNGKey(0)
    k_z, k_x, k_p = jax.random.split(key, 3)

    num_nodes = 16
    hidden_channel = 32
    middle_channels = (64, 32)
    alpha = 0.5

    # small ring graph with self loops, edges stored as (2, E) = [src; dst]
    idx = np.arange(num_nodes)
    src = np.concatenate([idx, idx, idx])
    dst = np.concatenate([(idx + 1) % num_nodes, (idx - 1) % num_nodes, idx])
    edge_index = jnp.asarray(np.stack([src, dst]), jnp.int32)          # (2, 48)

    deg = np.zeros(num_nodes, np.float32)
    np.add.at(deg, dst, 1.0)
    norm_factor = jnp.asarray(deg, jnp.float32).reshape(num_nodes, 1) ** -0.5  # (N, 1)

    z = jax.random.normal(k_z, (num_nodes, hidden_channel), jnp.float32)
    x = jax.random.normal(k_x, (num_nodes, hidden_channel), jnp.float32)
    batch = jnp.zeros((num_nodes,), jnp.int32)   # single graph (norm is identity)

    module = ImplicitModulePallas(hidden_channel, middle_channels, alpha, k_p)
    ref = module.forward_ref(z, x, edge_index, norm_factor, batch)

    # adjacency built once per graph, reused across layers and calls
    adj = module.build_adjacency(edge_index, num_nodes)

    # f32 compute path: numerically faithful to the PyTorch module
    out_f32 = jax.block_until_ready(
        module.forward(z, x, edge_index, norm_factor, batch,
                       compute_dtype=jnp.float32, adj=adj))
    np.testing.assert_allclose(np.asarray(out_f32), np.asarray(ref),
                               rtol=5e-5, atol=5e-5)

    # bf16 MXU path (int8 adjacency, f32 nf scaling, f32 accumulation and blend):
    # the v5e/v6e/v7x perf configuration
    out_bf16 = jax.block_until_ready(
        module.forward(z, x, edge_index, norm_factor, batch,
                       compute_dtype=jnp.bfloat16, adj=adj))
    np.testing.assert_allclose(np.asarray(out_bf16), np.asarray(ref),
                               rtol=5e-2, atol=5e-2)

    print("KERNEL_OK")
</pallas_src>

<mosaic_0001>
module attributes {stable_mosaic.version = 11 : i64} {
  func.func @_h_kernel(%arg0: i32, %arg1: memref<256x128xf32, #tpu.memory_space<vmem>>, %arg2: memref<256x128xf32, #tpu.memory_space<vmem>>, %arg3: memref<128x128xf32, #tpu.memory_space<vmem>>, %arg4: memref<128x128xf32, #tpu.memory_space<vmem>>, %arg5: memref<1x128xf32, #tpu.memory_space<vmem>>, %arg6: memref<256x1xf32, #tpu.memory_space<vmem>>, %arg7: memref<256x128xf32, #tpu.memory_space<vmem>>) attributes {dimension_semantics = [#tpu.dimension_semantics<parallel>], iteration_bounds = array<i64: 1>, scalar_prefetch = 0 : i64, scratch_operands = 0 : i64, tpu.core_type = #tpu.core_type<tc>, window_params = [{transform_indices = @transform_0, window_bounds = array<i64: 256, 128>}, {transform_indices = @transform_1, window_bounds = array<i64: 256, 128>}, {pipeline_mode = #tpu.pipeline_mode<synchronous>, transform_indices = @transform_2, window_bounds = array<i64: 128, 128>}, {pipeline_mode = #tpu.pipeline_mode<synchronous>, transform_indices = @transform_3, window_bounds = array<i64: 128, 128>}, {pipeline_mode = #tpu.pipeline_mode<synchronous>, transform_indices = @transform_4, window_bounds = array<i64: 1, 128>}, {transform_indices = @transform_5, window_bounds = array<i64: 256, 1>}, {transform_indices = @transform_6, window_bounds = array<i64: 256, 128>}]} {
    %c0 = arith.constant 0 : index
    %c0_0 = arith.constant 0 : index
    %0 = vector.load %arg1[%c0, %c0_0] : memref<256x128xf32, #tpu.memory_space<vmem>>, vector<256x128xf32>
    %c0_1 = arith.constant 0 : index
    %c0_2 = arith.constant 0 : index
    %1 = vector.load %arg3[%c0_1, %c0_2] : memref<128x128xf32, #tpu.memory_space<vmem>>, vector<128x128xf32>
    %cst = arith.constant dense<0.000000e+00> : vector<256x128xf32>
    %2 = tpu.matmul %0, %1, %cst {dimension_numbers = #tpu.dot_dimension_numbers<[1], [0], [0], [1], [0, 0, 1, 1], [], []>} : vector<256x128xf32>, vector<128x128xf32>, vector<256x128xf32> -> vector<256x128xf32>
    %c0_3 = arith.constant 0 : index
    %c0_4 = arith.constant 0 : index
    %3 = vector.load %arg2[%c0_3, %c0_4] : memref<256x128xf32, #tpu.memory_space<vmem>>, vector<256x128xf32>
    %c0_5 = arith.constant 0 : index
    %c0_6 = arith.constant 0 : index
    %4 = vector.load %arg4[%c0_5, %c0_6] : memref<128x128xf32, #tpu.memory_space<vmem>>, vector<128x128xf32>
    %cst_7 = arith.constant dense<0.000000e+00> : vector<256x128xf32>
    %5 = tpu.matmul %3, %4, %cst_7 {dimension_numbers = #tpu.dot_dimension_numbers<[1], [0], [0], [1], [0, 0, 1, 1], [], []>} : vector<256x128xf32>, vector<128x128xf32>, vector<256x128xf32> -> vector<256x128xf32>
    %6 = arith.addf %2, %5 : vector<256x128xf32>
    %c0_8 = arith.constant 0 : index
    %c0_9 = arith.constant 0 : index
    %7 = vector.load %arg5[%c0_8, %c0_9] : memref<1x128xf32, #tpu.memory_space<vmem>>, vector<1x128xf32>
    %8 = vector.broadcast %7 : vector<1x128xf32> to vector<256x128xf32>
    %9 = arith.addf %6, %8 : vector<256x128xf32>
    %c0_10 = arith.constant 0 : index
    %c0_11 = arith.constant 0 : index
    %10 = vector.load %arg6[%c0_10, %c0_11] : memref<256x1xf32, #tpu.memory_space<vmem>>, vector<256x1xf32>
    %11 = math.tanh %9 : vector<256x128xf32>
    %12 = vector.broadcast %10 : vector<256x1xf32> to vector<256x128xf32>
    %13 = arith.mulf %12, %11 : vector<256x128xf32>
    %c0_12 = arith.constant 0 : index
    %c0_13 = arith.constant 0 : index
    %14 = vector.load %arg7[%c0_12, %c0_13] : memref<256x128xf32, #tpu.memory_space<vmem>>, vector<256x128xf32>
    tpu.vector_store %arg7[%c0_12, %c0_13], %13 {strides = array<i32>} : memref<256x128xf32, #tpu.memory_space<vmem>>, vector<256x128xf32>,
    return
  }
  func.func @transform_0(%arg0: i32) -> (i32, i32) {
    %c0_i32 = arith.constant 0 : i32
    %c0_i32_0 = arith.constant 0 : i32
    return %arg0, %c0_i32 : i32, i32
  }
  func.func @transform_1(%arg0: i32) -> (i32, i32) {
    %c0_i32 = arith.constant 0 : i32
    %c0_i32_0 = arith.constant 0 : i32
    return %arg0, %c0_i32 : i32, i32
  }
  func.func @transform_2(%arg0: i32) -> (i32, i32) {
    %c0_i32 = arith.constant 0 : i32
    %c0_i32_0 = arith.constant 0 : i32
    %c0_i32_1 = arith.constant 0 : i32
    return %c0_i32, %c0_i32_0 : i32, i32
  }
  func.func @transform_3(%arg0: i32) -> (i32, i32) {
    %c0_i32 = arith.constant 0 : i32
    %c0_i32_0 = arith.constant 0 : i32
    %c0_i32_1 = arith.constant 0 : i32
    return %c0_i32, %c0_i32_0 : i32, i32
  }
  func.func @transform_4(%arg0: i32) -> (i32, i32) {
    %c0_i32 = arith.constant 0 : i32
    %c0_i32_0 = arith.constant 0 : i32
    %c0_i32_1 = arith.constant 0 : i32
    return %c0_i32, %c0_i32_0 : i32, i32
  }
  func.func @transform_5(%arg0: i32) -> (i32, i32) {
    %c0_i32 = arith.constant 0 : i32
    %c0_i32_0 = arith.constant 0 : i32
    return %arg0, %c0_i32 : i32, i32
  }
  func.func @transform_6(%arg0: i32) -> (i32, i32) {
    %c0_i32 = arith.constant 0 : i32
    %c0_i32_0 = arith.constant 0 : i32
    return %arg0, %c0_i32 : i32, i32
  }
}

</mosaic_0001>

<bundles_post_ra>
// kernel: tpu_custom_call.1
= control target key start
LH: loop header
LB: loop body
LE: loop exit
PB: predicated region body
PF: predicated region fallthrough
CT: control target
= control target key end

     0   :  { %11 = vsyncpa [#allocation3], 0  ;;  %s1865_s0 = inlined_call_operand.vmem [shape: f32[256,128], index: 0, kind: input, shape index: {}]   ;;  %s1866_s1 = inlined_call_operand.hbm [shape: f32[256,128], index: 1, kind: input, shape index: {}]   ;;  %s1867_s2 = inlined_call_operand.hbm [shape: f32[128,128], index: 2, kind: input, shape index: {}]   ;;  %s1868_s3 = inlined_call_operand.hbm [shape: f32[128,128], index: 3, kind: input, shape index: {}]   ;;  %s1869_s4 = inlined_call_operand.vmem [shape: f32[1,128], index: 4, kind: input, shape index: {}]   ;;  %s1870_s5 = inlined_call_operand.vmem [shape: f32[256,1], index: 5, kind: input, shape index: {}]   ;;  %s1871_s6 = inlined_call_operand.hbm [shape: f32[256,128], index: 6, kind: output, shape index: {}]  }
   0x1   :  { %12 = vsyncpa [#allocation6], 0 }
   0x2   :  { %13 = vsyncpa [#allocation4], 0  ;;  %s1476_s21 = smov [#allocation5]   ;;  %s1477_s23 = smov [#allocation2]  }
   0x3   :  { %s33_s22 = sshll.u32 %s1476_s21, 4  ;;  %s21_s24 = sshll.u32 %s1477_s23, 4  ;;  %s34_s22 = int_to_ptr.vmem [resolvable:$true] %s33_s22  ;;  %s1518_s24 = int_to_ptr.vmem [resolvable:$true] %s21_s24 }
   0x4   :  { %s1382_s27 = scalar_lea.hbm %s1867_s2, 2048 }
   0x5   :  { %p1383_p0 = scmp.ne.s32.totalorder %s1867_s2, %s1382_s27  ;;  %p1386_p1 = scmp.lt.u32.totalorder %s1382_s27, %s1867_s2 }
   0x7   :  { %p1388_p2 = pnand %p1386_p1, %p1383_p0 }
   0x9   :  { %1391 = shalt.err (!%p1388_p2)
}
   0xa   :  { %s1392_s8 = scalar_lea.vmem %s34_s22, 2048  ;;  %p1397_p4 = scmp.lt.s32.totalorder %s34_s22, %s34_s22 }
   0xb   :  { %p1393_p3 = scmp.ne.s32.totalorder %s34_s22, %s1392_s8  ;;  %p1398_p5 = scmp.lt.s32.totalorder %s1392_s8, %s1392_s8 }
   0xd   :  { %p1399_p6 = por %p1398_p5, %p1397_p4 }
   0xf   :  { %p1400_p7 = pnand %p1399_p6, %p1393_p3 }
  0x11   :  { %1403 = shalt.err (!%p1400_p7)
}
  0x12   :  { %s1478_s9 = smov 128   ;;  %s1479_s10 = smov 8  }
  0x13   :  { %39 = dma.hbm_to_vmem [thread:$0]  %s1867_s2, 2048, %s34_s22, [#allocation6], %s1478_s9, %s1478_s9, %s1479_s10  }
  0x14   :  { %s1404_s15 = scalar_lea.hbm %s1866_s1, 4096 }
  0x15   :  { %p1405_p8 = scmp.ne.s32.totalorder %s1866_s1, %s1404_s15  ;;  %p1408_p9 = scmp.lt.u32.totalorder %s1404_s15, %s1866_s1 }
  0x17   :  { %p1410_p10 = pnand %p1408_p9, %p1405_p8 }
  0x19   :  { %1413 = shalt.err (!%p1410_p10)
}
  0x1a   :  { %s1414_s20 = scalar_lea.vmem %s1518_s24, 4096  ;;  %p1419_p12 = scmp.lt.s32.totalorder %s1518_s24, %s1518_s24 }
  0x1b   :  { %p1415_p11 = scmp.ne.s32.totalorder %s1518_s24, %s1414_s20  ;;  %p1420_p13 = scmp.lt.s32.totalorder %s1414_s20, %s1414_s20 }
  0x1d   :  { %p1421_p0 = por %p1420_p13, %p1419_p12 }
  0x1f   :  { %p1422_p1 = pnand %p1421_p0, %p1415_p11 }
  0x21   :  { %1425 = shalt.err (!%p1422_p1)
}
  0x22   :  { %27 = dma.hbm_to_vmem [thread:$0]  %s1866_s1, 4096, %s1518_s24, [#allocation3], %s1478_s9, %s1478_s9, %s1479_s10  }
  0x23   :  { %s1480_s22 = smov [#allocation7]   ;;  %s1426_s27 = scalar_lea.hbm %s1868_s3, 2048 }
  0x24   :  { %s45_s23 = sshll.u32 %s1480_s22, 4  ;;  %p1427_p2 = scmp.ne.s32.totalorder %s1868_s3, %s1426_s27  ;;  %s46_s23 = int_to_ptr.vmem [resolvable:$true] %s45_s23 }
  0x25   :  { %p1430_p3 = scmp.lt.u32.totalorder %s1426_s27, %s1868_s3 }
  0x27   :  { %p1432_p4 = pnand %p1430_p3, %p1427_p2 }
  0x29   :  { %1435 = shalt.err (!%p1432_p4)
}
  0x2a   :  { %s1436_s8 = scalar_lea.vmem %s46_s23, 2048  ;;  %p1441_p6 = scmp.lt.s32.totalorder %s46_s23, %s46_s23 }
  0x2b   :  { %p1437_p5 = scmp.ne.s32.totalorder %s46_s23, %s1436_s8  ;;  %p1442_p7 = scmp.lt.s32.totalorder %s1436_s8, %s1436_s8 }
  0x2d   :  { %p1443_p8 = por %p1442_p7, %p1441_p6 }
  0x2f   :  { %p1444_p9 = pnand %p1443_p8, %p1437_p5 }
  0x31   :  { %1447 = shalt.err (!%p1444_p9)
}
  0x32   :  { %51 = dma.hbm_to_vmem [thread:$0]  %s1868_s3, 2048, %s46_s23, [#allocation6], %s1478_s9, %s1478_s9, %s1479_s10  }
  0x33   :  { %1470 = dma.done.wait [#allocation3], 4096  }
  0x34   :  { %1471 = vsyncadd [#allocation3], 4294963200 }
  0x35   :  { %1472 = dma.done.wait [#allocation6], 4096  }
  0x36   :  { %1473 = vsyncadd [#allocation6], 4294963200  ;;  %v1481_v0 = vmov 0   ;;  %v145_v1 = vld [vmem:[#allocation7] sm:$0xff]  ;;  %v146_v2 = vld [vmem:[#allocation7 + $0x8] sm:$0xff] }
  0x37   :  { %1317 = vset.pattern.permute.xlu1 %v1481_v0  ;;  %1316 = vset.pattern.permute.xlu0 %v1481_v0  ;;  %v97_v3 = vld [vmem:[#allocation5] sm:$0xff]  ;;  %v1213_v4 = vpack.c.bf16 %v146_v2, %v145_v1  ;;  %v98_v5 = vld [vmem:[#allocation5 + $0x8] sm:$0xff]  ;;  %v147_v6 = vld [vmem:[#allocation7 + $0x10] sm:$0xff] }
  0x38   :  { %v148_v7 = vld [vmem:[#allocation7 + $0x18] sm:$0xff]  ;;  %v1245_v8 = vpack.c.bf16 %v98_v5, %v97_v3  ;;  %v99_v10 = vld [vmem:[#allocation5 + $0x10] sm:$0xff]  ;;  %v149_v12 = vld [vmem:[#allocation7 + $0x20] sm:$0xff] }
  0x39   :  { %v1217_v9 = vpack.c.bf16 %v148_v7, %v147_v6  ;;  %v100_v11 = vld [vmem:[#allocation5 + $0x18] sm:$0xff]  ;;  %1214 = vmatprep.subr.bf16.mxu1 %v1213_v4  ;;  %v150_v14 = vld [vmem:[#allocation7 + $0x28] sm:$0xff]  ;;  %v101_v15 = vld [vmem:[#allocation5 + $0x20] sm:$0xff] }
  0x3a   :  { %v1249_v13 = vpack.c.bf16 %v100_v11, %v99_v10  ;;  %v102_v16 = vld [vmem:[#allocation5 + $0x28] sm:$0xff]  ;;  %1246 = vmatprep.subr.bf16.mxu0 %v1245_v8  ;;  %1216 = vmatpush3.bf16.msra.mxu1 %v1213_v4  ;;  %v1221_v17 = vpack.c.bf16 %v150_v14, %v149_v12  ;;  %v151_v19 = vld [vmem:[#allocation7 + $0x30] sm:$0xff]  ;;  %v152_v20 = vld [vmem:[#allocation7 + $0x38] sm:$0xff] }
  0x3b   :  { %1248 = vmatpush3.bf16.msra.mxu0 %v1245_v8  ;;  %1218 = vmatprep.subr.bf16.mxu1 %v1217_v9  ;;  %v1253_v18 = vpack.c.bf16 %v102_v16, %v101_v15  ;;  %v103_v21 = vld [vmem:[#allocation5 + $0x30] sm:$0xff]  ;;  %v104_v22 = vld [vmem:[#allocation5 + $0x38] sm:$0xff]  ;;  %v1225_v23 = vpack.c.bf16 %v152_v20, %v151_v19  ;;  %v153_v25 = vld [vmem:[#allocation7 + $0x40] sm:$0xff] }
  0x3c   :  { %1250 = vmatprep.subr.bf16.mxu0 %v1249_v13  ;;  %v1257_v24 = vpack.c.bf16 %v104_v22, %v103_v21  ;;  %v154_v26 = vld [vmem:[#allocation7 + $0x48] sm:$0xff]  ;;  %v113_v27 = vld [vmem:[#allocation2] sm:$0xff]  ;;  %v155_v33 = vld [vmem:[#allocation7 + $0x50] sm:$0xff] }
  0x3d   :  { %v105_v28 = vld [vmem:[#allocation5 + $0x40] sm:$0xff]  ;;  %v106_v29 = vld [vmem:[#allocation5 + $0x48] sm:$0xff]  ;;  %1085 = vmatprep.mubr.f32.mxu1 %v113_v27  ;;  %v1229_v31 = vpack.c.bf16 %v154_v26, %v153_v25  ;;  %v156_v34 = vld [vmem:[#allocation7 + $0x58] sm:$0xff] }
  0x3e   :  { %1220 = vmatpush3.bf16.msra.mxu1 %v1217_v9  ;;  %v65_v30 = vld [vmem:[%s1865_s0] sm:$0xff]  ;;  %v1261_v32 = vpack.c.bf16 %v106_v29, %v105_v28  ;;  %v107_v35 = vld [vmem:[#allocation5 + $0x50] sm:$0xff]  ;;  %v108_v36 = vld [vmem:[#allocation5 + $0x58] sm:$0xff]  ;;  %v1233_v37 = vpack.c.bf16 %v156_v34, %v155_v33 }
  0x3f   :  { %1252 = vmatpush3.bf16.msra.mxu0 %v1249_v13  ;;  %1222 = vmatprep.subr.bf16.mxu1 %v1221_v17  ;;  %v1265_v38 = vpack.c.bf16 %v108_v36, %v107_v35  ;;  %v157_v39 = vld [vmem:[#allocation7 + $0x60] sm:$0xff]  ;;  %v158_v40 = vld [vmem:[#allocation7 + $0x68] sm:$0xff]  ;;  %v159_v45 = vld [vmem:[#allocation7 + $0x70] sm:$0xff] }
  0x40   :  { %1254 = vmatprep.subr.bf16.mxu0 %v1253_v18  ;;  %1165 = vmatprep.mubr.f32.mxu0 %v65_v30  ;;  %v109_v41 = vld [vmem:[#allocation5 + $0x60] sm:$0xff]  ;;  %v110_v42 = vld [vmem:[#allocation5 + $0x68] sm:$0xff]  ;;  %v1237_v43 = vpack.c.bf16 %v158_v40, %v157_v39  ;;  %v160_v46 = vld [vmem:[#allocation7 + $0x78] sm:$0xff] }
  0x41   :  { %v1269_v44 = vpack.c.bf16 %v110_v42, %v109_v41  ;;  %v111_v47 = vld [vmem:[#allocation5 + $0x70] sm:$0xff]  ;;  %v112_v48 = vld [vmem:[#allocation5 + $0x78] sm:$0xff]  ;;  %v1241_v50 = vpack.c.bf16 %v160_v46, %v159_v45  ;;  %v650_v51 = vld [vmem:[%s1870_s5] sm:$0xff] }
  0x42   :  { %1224 = vmatpush3.bf16.msra.mxu1 %v1221_v17  ;;  %v652_v49 = vld [vmem:[%s1870_s5 + $0x10] sm:$0xff]  ;;  %v1273_v52 = vpack.c.bf16 %v112_v48, %v111_v47  ;;  %716 = vperm.xlu0 %1316, %v650_v51   ;;  %v653_v53 = vld [vmem:[%s1870_s5 + $0x18] sm:$0xff]  ;;  %v651_v54 = vld [vmem:[%s1870_s5 + $0x8] sm:$0xff] }
  0x43   :  { %1256 = vmatpush3.bf16.msra.mxu0 %v1253_v18  ;;  %1226 = vmatprep.subr.bf16.mxu1 %v1225_v23  ;;  %v655_v55 = vld [vmem:[%s1870_s5 + $0x28] sm:$0xff]  ;;  %v654_v57 = vld [vmem:[%s1870_s5 + $0x20] sm:$0xff]  ;;  %v115_v59 = vld [vmem:[#allocation2 + $0x10] sm:$0xff] }
  0x44   :  { %1258 = vmatprep.subr.bf16.mxu0 %v1257_v24  ;;  %726 = vperm.xlu1 %1317, %v652_v49   ;;  %v114_v56 = vld [vmem:[#allocation2 + $0x8] sm:$0xff]  ;;  %v67_v60 = vld [vmem:[%s1865_s0 + $0x10] sm:$0xff]  ;;  %v657_v61 = vld [vmem:[%s1870_s5 + $0x38] sm:$0xff] }
  0x45   :  { %v66_v58 = vld [vmem:[%s1865_s0 + $0x8] sm:$0xff]  ;;  %v116_v62 = vld [vmem:[#allocation2 + $0x18] sm:$0xff]  ;;  %v656_v63 = vld [vmem:[%s1870_s5 + $0x30] sm:$0xff] }
  0x46   :  { %1228 = vmatpush3.bf16.msra.mxu1 %v1225_v23  ;;  %721 = vperm.xlu0 %1316, %v651_v54   ;;  %v68_v0 = vld [vmem:[%s1865_s0 + $0x18] sm:$0xff]  ;;  %v117_v1 = vld [vmem:[#allocation2 + $0x20] sm:$0xff]  ;;  %v659_v3 = vld [vmem:[%s1870_s5 + $0x48] sm:$0xff] }
  0x47   :  { %1260 = vmatpush3.bf16.msra.mxu0 %v1257_v24  ;;  %1230 = vmatprep.subr.bf16.mxu1 %v1229_v31  ;;  %v69_v2 = vld [vmem:[%s1865_s0 + $0x20] sm:$0xff]  ;;  %v118_v4 = vld [vmem:[#allocation2 + $0x28] sm:$0xff]  ;;  %v119_v7 = vld [vmem:[#allocation2 + $0x30] sm:$0xff] }
  0x48   :  { %1262 = vmatprep.subr.bf16.mxu0 %v1261_v32  ;;  %731 = vperm.xlu1 %1317, %v653_v53   ;;  %v658_v5 = vld [vmem:[%s1870_s5 + $0x40] sm:$0xff]  ;;  %v70_v6 = vld [vmem:[%s1865_s0 + $0x28] sm:$0xff]  ;;  %v71_v8 = vld [vmem:[%s1865_s0 + $0x30] sm:$0xff] }
  0x49   :  { %v661_v9 = vld [vmem:[%s1870_s5 + $0x58] sm:$0xff]  ;;  %v660_v11 = vld [vmem:[%s1870_s5 + $0x50] sm:$0xff]  ;;  %v121_v13 = vld [vmem:[#allocation2 + $0x40] sm:$0xff] }
  0x4a   :  { %1232 = vmatpush3.bf16.msra.mxu1 %v1229_v31  ;;  %736 = vperm.xlu0 %1316, %v654_v57   ;;  %v120_v10 = vld [vmem:[#allocation2 + $0x38] sm:$0xff]  ;;  %v73_v14 = vld [vmem:[%s1865_s0 + $0x40] sm:$0xff]  ;;  %v663_v15 = vld [vmem:[%s1870_s5 + $0x68] sm:$0xff] }
  0x4b   :  { %1264 = vmatpush3.bf16.msra.mxu0 %v1261_v32  ;;  %1234 = vmatprep.subr.bf16.mxu1 %v1233_v37  ;;  %v72_v12 = vld [vmem:[%s1865_s0 + $0x38] sm:$0xff]  ;;  %v122_v16 = vld [vmem:[#allocation2 + $0x48] sm:$0xff]  ;;  %v662_v17 = vld [vmem:[%s1870_s5 + $0x60] sm:$0xff] }
  0x4c   :  { %1266 = vmatprep.subr.bf16.mxu0 %v1265_v38  ;;  %741 = vperm.xlu1 %1317, %v655_v55   ;;  %v74_v18 = vld [vmem:[%s1865_s0 + $0x48] sm:$0xff]  ;;  %v123_v19 = vld [vmem:[#allocation2 + $0x50] sm:$0xff]  ;;  %v665_v21 = vld [vmem:[%s1870_s5 + $0x78] sm:$0xff] }
  0x4d   :  { %v75_v20 = vld [vmem:[%s1865_s0 + $0x50] sm:$0xff]  ;;  %v124_v22 = vld [vmem:[#allocation2 + $0x58] sm:$0xff]  ;;  %v125_v25 = vld [vmem:[#allocation2 + $0x60] sm:$0xff] }
  0x4e   :  { %1236 = vmatpush3.bf16.msra.mxu1 %v1233_v37  ;;  %746 = vperm.xlu0 %1316, %v656_v63   ;;  %v664_v23 = vld [vmem:[%s1870_s5 + $0x70] sm:$0xff]  ;;  %v76_v24 = vld [vmem:[%s1865_s0 + $0x58] sm:$0xff]  ;;  %v77_v26 = vld [vmem:[%s1865_s0 + $0x60] sm:$0xff] }
  0x4f   :  { %1268 = vmatpush3.bf16.msra.mxu0 %v1265_v38  ;;  %1238 = vmatprep.subr.bf16.mxu1 %v1237_v43  ;;  %v667_v27 = vld [vmem:[%s1870_s5 + $0x88] sm:$0xff]  ;;  %v666_v29 = vld [vmem:[%s1870_s5 + $0x80] sm:$0xff]  ;;  %v127_v31 = vld [vmem:[#allocation2 + $0x70] sm:$0xff] }
  0x50   :  { %1270 = vmatprep.subr.bf16.mxu0 %v1269_v44  ;;  %751 = vperm.xlu1 %1317, %v657_v61   ;;  %v126_v28 = vld [vmem:[#allocation2 + $0x68] sm:$0xff]  ;;  %v79_v32 = vld [vmem:[%s1865_s0 + $0x70] sm:$0xff]  ;;  %v669_v33 = vld [vmem:[%s1870_s5 + $0x98] sm:$0xff] }
  0x51   :  { %v78_v30 = vld [vmem:[%s1865_s0 + $0x68] sm:$0xff]  ;;  %v128_v34 = vld [vmem:[#allocation2 + $0x78] sm:$0xff]  ;;  %v668_v35 = vld [vmem:[%s1870_s5 + $0x90] sm:$0xff] }
  0x52   :  { %1240 = vmatpush3.bf16.msra.mxu1 %v1237_v43  ;;  %756 = vperm.xlu0 %1316, %v658_v5   ;;  %v80_v36 = vld [vmem:[%s1865_s0 + $0x78] sm:$0xff]  ;;  %v129_v37 = vld [vmem:[#allocation2 + $0x80] sm:$0xff]  ;;  %v671_v39 = vld [vmem:[%s1870_s5 + $0xa8] sm:$0xff] }
  0x53   :  { %1272 = vmatpush3.bf16.msra.mxu0 %v1269_v44  ;;  %1242 = vmatprep.subr.bf16.mxu1 %v1241_v50  ;;  %v81_v38 = vld [vmem:[%s1865_s0 + $0x80] sm:$0xff]  ;;  %v130_v40 = vld [vmem:[#allocation2 + $0x88] sm:$0xff]  ;;  %v131_v43 = vld [vmem:[#allocation2 + $0x90] sm:$0xff] }
  0x54   :  { %1274 = vmatprep.subr.bf16.mxu0 %v1273_v52  ;;  %761 = vperm.xlu1 %1317, %v659_v3   ;;  %v670_v41 = vld [vmem:[%s1870_s5 + $0xa0] sm:$0xff]  ;;  %v82_v42 = vld [vmem:[%s1865_s0 + $0x88] sm:$0xff]  ;;  %v83_v44 = vld [vmem:[%s1865_s0 + $0x90] sm:$0xff] }
  0x55   :  { %v673_v45 = vld [vmem:[%s1870_s5 + $0xb8] sm:$0xff]  ;;  %v672_v47 = vld [vmem:[%s1870_s5 + $0xb0] sm:$0xff]  ;;  %v133_v49 = vld [vmem:[#allocation2 + $0xa0] sm:$0xff] }
  0x56   :  { %1244 = vmatpush3.bf16.msra.mxu1 %v1241_v50  ;;  %766 = vperm.xlu0 %1316, %v660_v11   ;;  %v132_v46 = vld [vmem:[#allocation2 + $0x98] sm:$0xff]  ;;  %v85_v50 = vld [vmem:[%s1865_s0 + $0xa0] sm:$0xff]  ;;  %v675_v51 = vld [vmem:[%s1870_s5 + $0xc8] sm:$0xff] }
  0x57   :  { %1276 = vmatpush3.bf16.msra.mxu0 %v1273_v52  ;;  %v84_v48 = vld [vmem:[%s1865_s0 + $0x98] sm:$0xff]  ;;  %v134_v52 = vld [vmem:[#allocation2 + $0xa8] sm:$0xff]  ;;  %v674_v53 = vld [vmem:[%s1870_s5 + $0xc0] sm:$0xff] }
  0x58   :  { %771 = vperm.xlu1 %1317, %v661_v9   ;;  %v86_v54 = vld [vmem:[%s1865_s0 + $0xa8] sm:$0xff]  ;;  %v135_v55 = vld [vmem:[#allocation2 + $0xb0] sm:$0xff]  ;;  %v677_v57 = vld [vmem:[%s1870_s5 + $0xd8] sm:$0xff] }
  0x59   :  { %1086 = vmatmul.mubr.f32.vlgmr.msra.gmra.mrb[0].mxu1 %v114_v56  ;;  %v87_v56 = vld [vmem:[%s1865_s0 + $0xb0] sm:$0xff]  ;;  %v137_v61 = vld [vmem:[#allocation2 + $0xc0] sm:$0xff]  ;;  %v679_v63 = vld [vmem:[%s1870_s5 + $0xe8] sm:$0xff] }
  0x5a   :  { %1166 = vmatmul.mubr.f32.vlgmr.msra.gmra.mrb[0].mxu0 %v66_v58  ;;  %1088 = vmatprep.mubr.f32.mxu1 %v115_v59  ;;  %v136_v58 = vld [vmem:[#allocation2 + $0xb8] sm:$0xff]  ;;  %v676_v59 = vld [vmem:[%s1870_s5 + $0xd0] sm:$0xff]  ;;  %v141_v9 = vld [vmem:[#allocation2 + $0xe0] sm:$0xff] }
  0x5b   :  { %1168 = vmatprep.mubr.f32.mxu0 %v67_v60  ;;  %776 = vperm.xlu0 %1316, %v662_v17   ;;  %v88_v60 = vld [vmem:[%s1865_s0 + $0xb8] sm:$0xff]  ;;  %v139_v3 = vld [vmem:[#allocation2 + $0xd0] sm:$0xff]  ;;  %v142_v11 = vld [vmem:[#allocation2 + $0xe8] sm:$0xff] }
  0x5c   :  { %781 = vperm.xlu1 %1317, %v663_v15   ;;  %v681_v5 = vld [vmem:[%s1870_s5 + $0xf8] sm:$0xff] }
  0x5d   :  { %1089 = vmatmul.mubr.f32.gmra.mrb[2].mxu1 %v116_v62  ;;  %v89_v62 = vld [vmem:[%s1865_s0 + $0xc0] sm:$0xff]  ;;  %v144_v15 = vld [vmem:[#allocation2 + $0xf8] sm:$0xff] }
  0x5e   :  { %1169 = vmatmul.mubr.f32.gmra.mrb[2].mxu0 %v68_v0  ;;  %1091 = vmatprep.mubr.f32.mxu1 %v117_v1  ;;  %v138_v0 = vld [vmem:[#allocation2 + $0xc8] sm:$0xff]  ;;  %v678_v1 = vld [vmem:[%s1870_s5 + $0xe0] sm:$0xff] }
  0x5f   :  { %1171 = vmatprep.mubr.f32.mxu0 %v69_v2  ;;  %786 = vperm.xlu0 %1316, %v664_v23   ;;  %v90_v2 = vld [vmem:[%s1865_s0 + $0xc8] sm:$0xff] }
  0x60   :  { %791 = vperm.xlu1 %1317, %v665_v21  }
  0x61   :  { %1092 = vmatmul.mubr.f32.gmra.mrb[4].mxu1 %v118_v4  ;;  %v91_v4 = vld [vmem:[%s1865_s0 + $0xd0] sm:$0xff] }
  0x62   :  { %1172 = vmatmul.mubr.f32.gmra.mrb[4].mxu0 %v70_v6  ;;  %1094 = vmatprep.mubr.f32.mxu1 %v119_v7  ;;  %v140_v6 = vld [vmem:[#allocation2 + $0xd8] sm:$0xff]  ;;  %v680_v7 = vld [vmem:[%s1870_s5 + $0xf0] sm:$0xff] }
  0x63   :  { %1174 = vmatprep.mubr.f32.mxu0 %v71_v8  ;;  %796 = vperm.xlu0 %1316, %v666_v29   ;;  %v92_v8 = vld [vmem:[%s1865_s0 + $0xd8] sm:$0xff] }
  0x64   :  { %801 = vperm.xlu1 %1317, %v667_v27  }
  0x65   :  { %1095 = vmatmul.mubr.f32.gmra.mrb[6].mxu1 %v120_v10  ;;  %v93_v10 = vld [vmem:[%s1865_s0 + $0xe0] sm:$0xff] }
  0x66   :  { %1175 = vmatmul.mubr.f32.gmra.mrb[6].mxu0 %v72_v12  ;;  %1097 = vmatprep.mubr.f32.mxu1 %v121_v13  ;;  %v94_v12 = vld [vmem:[%s1865_s0 + $0xe8] sm:$0xff]  ;;  %v143_v13 = vld [vmem:[#allocation2 + $0xf0] sm:$0xff] }
  0x67   :  { %1177 = vmatprep.mubr.f32.mxu0 %v73_v14  ;;  %806 = vperm.xlu0 %1316, %v668_v35   ;;  %v95_v14 = vld [vmem:[%s1865_s0 + $0xf0] sm:$0xff] }
  0x68   :  { %811 = vperm.xlu1 %1317, %v669_v33  }
  0x69   :  { %1098 = vmatmul.mubr.f32.gmra.mrb[8].mxu1 %v122_v16  ;;  %v96_v16 = vld [vmem:[%s1865_s0 + $0xf8] sm:$0xff]  ;;  %s1482_s0 = smov [#allocation8]  }
  0x6a   :  { %1178 = vmatmul.mubr.f32.gmra.mrb[8].mxu0 %v74_v18  ;;  %1100 = vmatprep.mubr.f32.mxu1 %v123_v19 }
  0x6b   :  { %1180 = vmatprep.mubr.f32.mxu0 %v75_v20  ;;  %816 = vperm.xlu0 %1316, %v670_v41  }
  0x6c   :  { %821 = vperm.xlu1 %1317, %v671_v39  }
  0x6d   :  { %1101 = vmatmul.mubr.f32.gmra.mrb[10].mxu1 %v124_v22 }
  0x6e   :  { %1181 = vmatmul.mubr.f32.gmra.mrb[10].mxu0 %v76_v24  ;;  %1103 = vmatprep.mubr.f32.mxu1 %v125_v25  ;;  %v1773_v25 = vld [vmem:[%s1869_s4] ss:$0 sm:$0xff]  ;;  %s943_s4 = sshll.u32 %s1482_s0, 4  ;;  %s944_s4 = int_to_ptr.vmem [resolvable:$true] %s943_s4 }
  0x6f   :  { %1183 = vmatprep.mubr.f32.mxu0 %v77_v26  ;;  %826 = vperm.xlu0 %1316, %v672_v47   ;;  %s1448_s14 = scalar_lea.vmem %s944_s4, 4096  ;;  %p1453_p11 = scmp.lt.s32.totalorder %s944_s4, %s944_s4 }
  0x70   :  { %831 = vperm.xlu1 %1317, %v673_v45   ;;  %p1449_p10 = scmp.ne.s32.totalorder %s944_s4, %s1448_s14  ;;  %p1454_p12 = scmp.lt.s32.totalorder %s1448_s14, %s1448_s14 }
  0x71   :  { %1104 = vmatmul.mubr.f32.gmra.mrb[12].mxu1 %v126_v28 }
  0x72   :  { %1184 = vmatmul.mubr.f32.gmra.mrb[12].mxu0 %v78_v30  ;;  %1106 = vmatprep.mubr.f32.mxu1 %v127_v31  ;;  %p1455_p13 = por %p1454_p12, %p1453_p11 }
  0x73   :  { %1186 = vmatprep.mubr.f32.mxu0 %v79_v32  ;;  %836 = vperm.xlu0 %1316, %v674_v53  }
  0x74   :  { %841 = vperm.xlu1 %1317, %v675_v51   ;;  %p1456_p0 = pnand %p1455_p13, %p1449_p10 }
  0x75   :  { %1107 = vmatmul.mubr.f32.gmra.mrb[14].mxu1 %v128_v34 }
  0x76   :  { %1187 = vmatmul.mubr.f32.gmra.mrb[14].mxu0 %v80_v36  ;;  %1109 = vmatprep.mubr.f32.mxu1 %v129_v37 }
  0x77   :  { %1189 = vmatprep.mubr.f32.mxu0 %v81_v38  ;;  %846 = vperm.xlu0 %1316, %v676_v59  }
  0x78   :  { %851 = vperm.xlu1 %1317, %v677_v57  }
  0x79   :  { %1110 = vmatmul.mubr.f32.gmra.mrb[16].mxu1 %v130_v40 }
  0x7a   :  { %1190 = vmatmul.mubr.f32.gmra.mrb[16].mxu0 %v82_v42  ;;  %1112 = vmatprep.mubr.f32.mxu1 %v131_v43 }
  0x7b   :  { %1192 = vmatprep.mubr.f32.mxu0 %v83_v44  ;;  %856 = vperm.xlu0 %1316, %v678_v1  }
  0x7c   :  { %861 = vperm.xlu1 %1317, %v679_v63  }
  0x7d   :  { %1113 = vmatmul.mubr.f32.gmra.mrb[18].mxu1 %v132_v46 }
  0x7e   :  { %1193 = vmatmul.mubr.f32.gmra.mrb[18].mxu0 %v84_v48  ;;  %1115 = vmatprep.mubr.f32.mxu1 %v133_v49 }
  0x7f   :  { %1195 = vmatprep.mubr.f32.mxu0 %v85_v50  ;;  %866 = vperm.xlu0 %1316, %v680_v7  }
  0x80   :  { %871 = vperm.xlu1 %1317, %v681_v5  }
  0x81   :  { %1116 = vmatmul.mubr.f32.gmra.mrb[20].mxu1 %v134_v52 }
  0x82   :  { %1196 = vmatmul.mubr.f32.gmra.mrb[20].mxu0 %v86_v54  ;;  %1118 = vmatprep.mubr.f32.mxu1 %v135_v55 }
  0x83   :  { %1198 = vmatprep.mubr.f32.mxu0 %v87_v56 }
  0x85   :  { %1119 = vmatmul.mubr.f32.gmra.mrb[22].mxu1 %v136_v58 }
  0x86   :  { %1199 = vmatmul.mubr.f32.gmra.mrb[22].mxu0 %v88_v60  ;;  %1121 = vmatprep.mubr.f32.mxu1 %v137_v61 }
  0x87   :  { %1201 = vmatprep.mubr.f32.mxu0 %v89_v62 }
  0x89   :  { %1122 = vmatmul.mubr.f32.gmra.mrb[24].mxu1 %v138_v0 }
  0x8a   :  { %1202 = vmatmul.mubr.f32.gmra.mrb[24].mxu0 %v90_v2  ;;  %1124 = vmatprep.mubr.f32.mxu1 %v139_v3 }
  0x8b   :  { %1204 = vmatprep.mubr.f32.mxu0 %v91_v4 }
  0x8d   :  { %1125 = vmatmul.mubr.f32.gmra.mrb[26].mxu1 %v140_v6 }
  0x8e   :  { %1205 = vmatmul.mubr.f32.gmra.mrb[26].mxu0 %v92_v8  ;;  %1127 = vmatprep.mubr.f32.mxu1 %v141_v9 }
  0x8f   :  { %1207 = vmatprep.mubr.f32.mxu0 %v93_v10 }
  0x91   :  { %1128 = vmatmul.mubr.f32.gmra.mrb[28].mxu1 %v142_v11 }
  0x92   :  { %1208 = vmatmul.mubr.f32.gmra.mrb[28].mxu0 %v94_v12  ;;  %1130 = vmatprep.mubr.f32.mxu1 %v143_v13 }
  0x93   :  { %1210 = vmatprep.mubr.f32.mxu0 %v95_v14 }
  0x95   :  { %1131 = vmatmul.mubr.f32.gmra.mrb[30].mxu1 %v144_v15 }
  0x96   :  { %1211 = vmatmul.mubr.f32.gmra.mrb[30].mxu0 %v96_v16 }
  0xc1   :  { %v717_v18 = vpop.permute.xlu0 %716 }
  0xc3   :  { %v1762_v17 = vpop.permute.xlu1 %726 }
  0xc5   :  { %v722_v20 = vpop.permute.xlu0 %721 }
  0xc7   :  { %v1764_v19 = vpop.permute.xlu1 %731 }
  0xc9   :  { %v1768_v22 = vpop.permute.xlu0 %736 }
  0xcb   :  { %v1766_v21 = vpop.permute.xlu1 %741 }
  0xcd   :  { %v1777_v31 = vpop.permute.xlu0 %746 }
  0xcf   :  { %v1775_v27 = vpop.permute.xlu1 %751 }
  0xd1   :  { %v1785_v46 = vpop.permute.xlu0 %756 }
  0xd3   :  { %v1781_v40 = vpop.permute.xlu1 %761 }
  0xd5   :  { %v1791_v60 = vpop.permute.xlu0 %766 }
  0xd7   :  { %v1789_v55 = vpop.permute.xlu1 %771 }
  0xdb   :  { %v1795_v9 = vpop.permute.xlu1 %781 }
 0x12c   :  { %v1087_v23 = vpop.f32.mrb[0].mxu1 }
 0x12d   :  { %v1167_v24 = vpop.f32.mrb[0].mxu0  ;;  %v227_v26 = vpop.f32.mrb[1].mxu1 }
 0x12e   :  { %v458_v28 = vadd.f32 %v1167_v24, %v1087_v23  ;;  %v452_v29 = vpop.f32.mrb[1].mxu0 }
 0x12f   :  { %v453_v30 = vadd.f32 %v452_v29, %v227_v26 }
 0x130   :  { %v619_v32 = vadd.f32 %v1773_v25, %v458_v28  ;;  %v1090_v33 = vpop.f32.mrb[2].mxu1 }
 0x131   :  { %v618_v34 = vadd.f32 %v1773_v25, %v453_v30  ;;  %v1170_v35 = vpop.f32.mrb[2].mxu0  ;;  %v237_v36 = vpop.f32.mrb[3].mxu1 }
 0x132   :  { %1318 = vtanh.f32 %v619_v32  ;;  %v468_v37 = vadd.f32 %v1170_v35, %v1090_v33  ;;  %v462_v38 = vpop.f32.mrb[3].mxu0 }
 0x133   :  { %1320 = vtanh.f32 %v618_v34  ;;  %v463_v39 = vadd.f32 %v462_v38, %v237_v36  ;;  %v1806_v36 = vpop.permute.xlu1 %791 }
 0x134   :  { %v621_v41 = vadd.f32 %v1773_v25, %v468_v37  ;;  %v1093_v42 = vpop.f32.mrb[4].mxu1 }
 0x135   :  { %v620_v43 = vadd.f32 %v1773_v25, %v463_v39  ;;  %v1173_v44 = vpop.f32.mrb[4].mxu0  ;;  %v247_v45 = vpop.f32.mrb[5].mxu1 }
 0x136   :  { %1322 = vtanh.f32 %v621_v41  ;;  %v478_v47 = vadd.f32 %v1173_v44, %v1093_v42  ;;  %v472_v48 = vpop.f32.mrb[5].mxu0 }
 0x137   :  { %1324 = vtanh.f32 %v620_v43  ;;  %v473_v49 = vadd.f32 %v472_v48, %v247_v45 }
 0x138   :  { %v623_v50 = vadd.f32 %v1773_v25, %v478_v47  ;;  %v1096_v51 = vpop.f32.mrb[6].mxu1 }
 0x139   :  { %v622_v52 = vadd.f32 %v1773_v25, %v473_v49  ;;  %v1176_v53 = vpop.f32.mrb[6].mxu0  ;;  %v257_v54 = vpop.f32.mrb[7].mxu1 }
 0x13a   :  { %1326 = vtanh.f32 %v623_v50  ;;  %v488_v56 = vadd.f32 %v1176_v53, %v1096_v51  ;;  %v482_v57 = vpop.f32.mrb[7].mxu0 }
 0x13b   :  { %1328 = vtanh.f32 %v622_v52  ;;  %v483_v58 = vadd.f32 %v482_v57, %v257_v54  ;;  %v1815_v54 = vpop.permute.xlu1 %801 }
 0x13c   :  { %v1319_v59 = vpop.eup %1318  ;;  %v625_v61 = vadd.f32 %v1773_v25, %v488_v56  ;;  %v1099_v62 = vpop.f32.mrb[8].mxu1 }
 0x13d   :  { %v1321_v63 = vpop.eup %1320  ;;  %v875_v0 = vmul.f32 %v1319_v59, %v722_v20  ;;  %v624_v1 = vadd.f32 %v1773_v25, %v483_v58  ;;  %v1179_v2 = vpop.f32.mrb[8].mxu0 }
 0x13e   :  { %v267_v3 = vpop.f32.mrb[9].mxu1  ;;  %v874_v4 = vmul.f32 %v1321_v63, %v717_v18  ;;  %1330 = vtanh.f32 %v625_v61  ;;  %v498_v5 = vadd.f32 %v1179_v2, %v1099_v62  ;;  %v492_v6 = vpop.f32.mrb[9].mxu0 }
 0x13f   :  { %907 = vst [vmem:[#allocation8 + $0x8] sm:$0xff] %v875_v0  ;;  %1332 = vtanh.f32 %v624_v1  ;;  %v493_v7 = vadd.f32 %v492_v6, %v267_v3  ;;  %v1800_v18 = vpop.permute.xlu0 %776 }
 0x140   :  { %v1323_v8 = vpop.eup %1322  ;;  %906 = vst [vmem:[#allocation8] sm:$0xff] %v874_v4  ;;  %v627_v10 = vadd.f32 %v1773_v25, %v498_v5  ;;  %v1102_v11 = vpop.f32.mrb[10].mxu1 }
 0x141   :  { %v1325_v12 = vpop.eup %1324  ;;  %v877_v13 = vmul.f32 %v1323_v8, %v1764_v19  ;;  %v626_v14 = vadd.f32 %v1773_v25, %v493_v7  ;;  %v1182_v15 = vpop.f32.mrb[10].mxu0 }
 0x142   :  { %v277_v16 = vpop.f32.mrb[11].mxu1  ;;  %v876_v20 = vmul.f32 %v1325_v12, %v1762_v17  ;;  %1334 = vtanh.f32 %v627_v10  ;;  %v508_v23 = vadd.f32 %v1182_v15, %v1102_v11  ;;  %v502_v24 = vpop.f32.mrb[11].mxu0 }
 0x143   :  { %909 = vst [vmem:[#allocation8 + $0x18] sm:$0xff] %v877_v13  ;;  %1336 = vtanh.f32 %v626_v14  ;;  %v503_v26 = vadd.f32 %v502_v24, %v277_v16  ;;  %v1809_v42 = vpop.permute.xlu0 %786  ;;  %v1826_v11 = vpop.permute.xlu1 %811 }
 0x144   :  { %v1327_v28 = vpop.eup %1326  ;;  %908 = vst [vmem:[#allocation8 + $0x10] sm:$0xff] %v876_v20  ;;  %v629_v29 = vadd.f32 %v1773_v25, %v508_v23  ;;  %v1105_v30 = vpop.f32.mrb[12].mxu1 }
 0x145   :  { %v1329_v19 = vpop.eup %1328  ;;  %v879_v32 = vmul.f32 %v1327_v28, %v1766_v21  ;;  %v628_v33 = vadd.f32 %v1773_v25, %v503_v26  ;;  %v1185_v34 = vpop.f32.mrb[12].mxu0 }
 0x146   :  { %v287_v35 = vpop.f32.mrb[13].mxu1  ;;  %v878_v17 = vmul.f32 %v1329_v19, %v1768_v22  ;;  %1338 = vtanh.f32 %v629_v29  ;;  %v518_v37 = vadd.f32 %v1185_v34, %v1105_v30  ;;  %v512_v38 = vpop.f32.mrb[13].mxu0 }
 0x147   :  { %911 = vst [vmem:[#allocation8 + $0x28] sm:$0xff] %v879_v32  ;;  %1340 = vtanh.f32 %v628_v33  ;;  %v513_v39 = vadd.f32 %v512_v38, %v287_v35  ;;  %v1820_v62 = vpop.permute.xlu0 %796  ;;  %v822_v34 = vpop.permute.xlu1 %821 }
 0x148   :  { %v1331_v41 = vpop.eup %1330  ;;  %910 = vst [vmem:[#allocation8 + $0x20] sm:$0xff] %v878_v17  ;;  %v631_v21 = vadd.f32 %v1773_v25, %v518_v37  ;;  %v1108_v43 = vpop.f32.mrb[14].mxu1 }
 0x149   :  { %v1333_v44 = vpop.eup %1332  ;;  %v881_v45 = vmul.f32 %v1331_v41, %v1775_v27  ;;  %v630_v47 = vadd.f32 %v1773_v25, %v513_v39  ;;  %v1188_v48 = vpop.f32.mrb[14].mxu0 }
 0x14a   :  { %v297_v22 = vpop.f32.mrb[15].mxu1  ;;  %v880_v49 = vmul.f32 %v1333_v44, %v1777_v31  ;;  %1342 = vtanh.f32 %v631_v21  ;;  %v528_v50 = vadd.f32 %v1188_v48, %v1108_v43  ;;  %v522_v51 = vpop.f32.mrb[15].mxu0 }
 0x14b   :  { %913 = vst [vmem:[#allocation8 + $0x38] sm:$0xff] %v881_v45  ;;  %1344 = vtanh.f32 %v630_v47  ;;  %v523_v52 = vadd.f32 %v522_v51, %v297_v22  ;;  %v807_v16 = vpop.permute.xlu0 %806 }
 0x14c   :  { %v1335_v53 = vpop.eup %1334  ;;  %912 = vst [vmem:[#allocation8 + $0x30] sm:$0xff] %v880_v49  ;;  %v633_v56 = vadd.f32 %v1773_v25, %v528_v50  ;;  %v1111_v57 = vpop.f32.mrb[16].mxu1 }
 0x14d   :  { %v1337_v27 = vpop.eup %1336  ;;  %v883_v58 = vmul.f32 %v1335_v53, %v1781_v40  ;;  %v632_v59 = vadd.f32 %v1773_v25, %v523_v52  ;;  %v1191_v61 = vpop.f32.mrb[16].mxu0 }
 0x14e   :  { %v307_v31 = vpop.f32.mrb[17].mxu1  ;;  %v882_v63 = vmul.f32 %v1337_v27, %v1785_v46  ;;  %1346 = vtanh.f32 %v633_v56  ;;  %v538_v0 = vadd.f32 %v1191_v61, %v1111_v57  ;;  %v532_v1 = vpop.f32.mrb[17].mxu0 }
 0x14f   :  { %915 = vst [vmem:[#allocation8 + $0x48] sm:$0xff] %v883_v58  ;;  %1348 = vtanh.f32 %v632_v59  ;;  %v533_v2 = vadd.f32 %v532_v1, %v307_v31  ;;  %v832_v57 = vpop.permute.xlu1 %831 }
 0x150   :  { %v1339_v3 = vpop.eup %1338  ;;  %914 = vst [vmem:[#allocation8 + $0x40] sm:$0xff] %v882_v63  ;;  %v635_v4 = vadd.f32 %v1773_v25, %v538_v0  ;;  %v1114_v5 = vpop.f32.mrb[18].mxu1 }
 0x151   :  { %v1341_v40 = vpop.eup %1340  ;;  %v885_v6 = vmul.f32 %v1339_v3, %v1789_v55  ;;  %v634_v7 = vadd.f32 %v1773_v25, %v533_v2  ;;  %v1194_v8 = vpop.f32.mrb[18].mxu0 }
 0x152   :  { %v317_v10 = vpop.f32.mrb[19].mxu1  ;;  %v884_v46 = vmul.f32 %v1341_v40, %v1791_v60  ;;  %1350 = vtanh.f32 %v635_v4  ;;  %v548_v12 = vadd.f32 %v1194_v8, %v1114_v5  ;;  %v542_v13 = vpop.f32.mrb[19].mxu0 }
 0x153   :  { %917 = vst [vmem:[#allocation8 + $0x58] sm:$0xff] %v885_v6  ;;  %1352 = vtanh.f32 %v634_v7  ;;  %v543_v14 = vadd.f32 %v542_v13, %v317_v10  ;;  %v842_v13 = vpop.permute.xlu1 %841 }
 0x154   :  { %v1343_v15 = vpop.eup %1342  ;;  %916 = vst [vmem:[#allocation8 + $0x50] sm:$0xff] %v884_v46  ;;  %v637_v20 = vadd.f32 %v1773_v25, %v548_v12  ;;  %v1117_v55 = vpop.f32.mrb[20].mxu1 }
 0x155   :  { %v1345_v23 = vpop.eup %1344  ;;  %v887_v24 = vmul.f32 %v1343_v15, %v1795_v9  ;;  %v636_v26 = vadd.f32 %v1773_v25, %v543_v14  ;;  %v1197_v28 = vpop.f32.mrb[20].mxu0 }
 0x156   :  { %v327_v29 = vpop.f32.mrb[21].mxu1  ;;  %v886_v60 = vmul.f32 %v1345_v23, %v1800_v18  ;;  %1354 = vtanh.f32 %v637_v20  ;;  %v558_v30 = vadd.f32 %v1197_v28, %v1117_v55  ;;  %v552_v19 = vpop.f32.mrb[21].mxu0 }
 0x157   :  { %919 = vst [vmem:[#allocation8 + $0x68] sm:$0xff] %v887_v24  ;;  %1356 = vtanh.f32 %v636_v26  ;;  %v553_v32 = vadd.f32 %v552_v19, %v327_v29  ;;  %v817_v18 = vpop.permute.xlu0 %816 }
 0x158   :  { %v1347_v33 = vpop.eup %1346  ;;  %918 = vst [vmem:[#allocation8 + $0x60] sm:$0xff] %v886_v60  ;;  %v639_v35 = vadd.f32 %v1773_v25, %v558_v30  ;;  %v1120_v17 = vpop.f32.mrb[22].mxu1 }
 0x159   :  { %v1349_v37 = vpop.eup %1348  ;;  %v889_v9 = vmul.f32 %v1347_v33, %v1806_v36  ;;  %v638_v38 = vadd.f32 %v1773_v25, %v553_v32  ;;  %v1200_v39 = vpop.f32.mrb[22].mxu0 }
 0x15a   :  { %v337_v41 = vpop.f32.mrb[23].mxu1  ;;  %v888_v21 = vmul.f32 %v1349_v37, %v1809_v42  ;;  %1358 = vtanh.f32 %v639_v35  ;;  %v568_v43 = vadd.f32 %v1200_v39, %v1120_v17  ;;  %v562_v44 = vpop.f32.mrb[23].mxu0 }
 0x15b   :  { %921 = vst [vmem:[#allocation8 + $0x78] sm:$0xff] %v889_v9  ;;  %1360 = vtanh.f32 %v638_v38  ;;  %v563_v45 = vadd.f32 %v562_v44, %v337_v41  ;;  %v827_v59 = vpop.permute.xlu0 %826  ;;  %v852_v37 = vpop.permute.xlu1 %851 }
 0x15c   :  { %v1351_v47 = vpop.eup %1350  ;;  %920 = vst [vmem:[#allocation8 + $0x70] sm:$0xff] %v888_v21  ;;  %v641_v48 = vadd.f32 %v1773_v25, %v568_v43  ;;  %v1123_v22 = vpop.f32.mrb[24].mxu1 }
 0x15d   :  { %v1353_v49 = vpop.eup %1352  ;;  %v891_v36 = vmul.f32 %v1351_v47, %v1815_v54  ;;  %v640_v50 = vadd.f32 %v1773_v25, %v563_v45  ;;  %v1203_v51 = vpop.f32.mrb[24].mxu0 }
 0x15e   :  { %v347_v52 = vpop.f32.mrb[25].mxu1  ;;  %v890_v42 = vmul.f32 %v1353_v49, %v1820_v62  ;;  %1362 = vtanh.f32 %v641_v48  ;;  %v578_v53 = vadd.f32 %v1203_v51, %v1123_v22  ;;  %v572_v56 = vpop.f32.mrb[25].mxu0 }
 0x15f   :  { %923 = vst [vmem:[#allocation8 + $0x88] sm:$0xff] %v891_v36  ;;  %1364 = vtanh.f32 %v640_v50  ;;  %v573_v27 = vadd.f32 %v572_v56, %v347_v52  ;;  %v837_v20 = vpop.permute.xlu0 %836  ;;  %v862_v47 = vpop.permute.xlu1 %861 }
 0x160   :  { %v1355_v58 = vpop.eup %1354  ;;  %922 = vst [vmem:[#allocation8 + $0x80] sm:$0xff] %v890_v42  ;;  %v643_v61 = vadd.f32 %v1773_v25, %v578_v53  ;;  %v1126_v31 = vpop.f32.mrb[26].mxu1 }
 0x161   :  { %v1357_v54 = vpop.eup %1356  ;;  %v893_v63 = vmul.f32 %v1355_v58, %v1826_v11  ;;  %v642_v0 = vadd.f32 %v1773_v25, %v573_v27  ;;  %v1206_v1 = vpop.f32.mrb[26].mxu0 }
 0x162   :  { %v357_v62 = vpop.f32.mrb[27].mxu1  ;;  %v892_v2 = vmul.f32 %v1357_v54, %v807_v16  ;;  %1366 = vtanh.f32 %v643_v61  ;;  %v588_v3 = vadd.f32 %v1206_v1, %v1126_v31  ;;  %v582_v4 = vpop.f32.mrb[27].mxu0 }
 0x163   :  { %925 = vst [vmem:[#allocation8 + $0x98] sm:$0xff] %v893_v63  ;;  %1368 = vtanh.f32 %v642_v0  ;;  %v583_v5 = vadd.f32 %v582_v4, %v357_v62  ;;  %v847_v39 = vpop.permute.xlu0 %846  ;;  %v872_v52 = vpop.permute.xlu1 %871 }
 0x164   :  { %v1359_v40 = vpop.eup %1358  ;;  %924 = vst [vmem:[#allocation8 + $0x90] sm:$0xff] %v892_v2  ;;  %v645_v6 = vadd.f32 %v1773_v25, %v588_v3  ;;  %v1129_v7 = vpop.f32.mrb[28].mxu1 }
 0x165   :  { %v1361_v8 = vpop.eup %1360  ;;  %v895_v10 = vmul.f32 %v1359_v40, %v822_v34  ;;  %v644_v11 = vadd.f32 %v1773_v25, %v583_v5  ;;  %v1209_v46 = vpop.f32.mrb[28].mxu0 }
 0x166   :  { %v367_v12 = vpop.f32.mrb[29].mxu1  ;;  %v894_v14 = vmul.f32 %v1361_v8, %v817_v18  ;;  %1370 = vtanh.f32 %v645_v6  ;;  %v598_v15 = vadd.f32 %v1209_v46, %v1129_v7  ;;  %v592_v16 = vpop.f32.mrb[29].mxu0 }
 0x167   :  { %927 = vst [vmem:[#allocation8 + $0xa8] sm:$0xff] %v895_v10  ;;  %1372 = vtanh.f32 %v644_v11  ;;  %v593_v55 = vadd.f32 %v592_v16, %v367_v12  ;;  %v857_v22 = vpop.permute.xlu0 %856 }
 0x168   :  { %v1363_v23 = vpop.eup %1362  ;;  %926 = vst [vmem:[#allocation8 + $0xa0] sm:$0xff] %v894_v14  ;;  %v647_v24 = vadd.f32 %v1773_v25, %v598_v15  ;;  %v1132_v26 = vpop.f32.mrb[30].mxu1 }
 0x169   :  { %v1365_v28 = vpop.eup %1364  ;;  %v897_v29 = vmul.f32 %v1363_v23, %v832_v57  ;;  %v646_v60 = vadd.f32 %v1773_v25, %v593_v55  ;;  %v1212_v30 = vpop.f32.mrb[30].mxu0 }
 0x16a   :  { %v377_v19 = vpop.f32.mrb[31].mxu1  ;;  %v896_v32 = vmul.f32 %v1365_v28, %v827_v59  ;;  %1374 = vtanh.f32 %v647_v24  ;;  %v608_v33 = vadd.f32 %v1212_v30, %v1132_v26  ;;  %v602_v34 = vpop.f32.mrb[31].mxu0 }
 0x16b   :  { %929 = vst [vmem:[#allocation8 + $0xb8] sm:$0xff] %v897_v29  ;;  %1376 = vtanh.f32 %v646_v60  ;;  %v603_v35 = vadd.f32 %v602_v34, %v377_v19  ;;  %v867_v53 = vpop.permute.xlu0 %866 }
 0x16c   :  { %v1367_v17 = vpop.eup %1366  ;;  %928 = vst [vmem:[#allocation8 + $0xb0] sm:$0xff] %v896_v32  ;;  %v649_v9 = vadd.f32 %v1773_v25, %v608_v33 }
 0x16d   :  { %v1369_v38 = vpop.eup %1368  ;;  %v899_v41 = vmul.f32 %v1367_v17, %v842_v13  ;;  %v648_v18 = vadd.f32 %v1773_v25, %v603_v35 }
 0x16e   :  { %v898_v21 = vmul.f32 %v1369_v38, %v837_v20  ;;  %1378 = vtanh.f32 %v649_v9 }
 0x16f   :  { %931 = vst [vmem:[#allocation8 + $0xc8] sm:$0xff] %v899_v41  ;;  %1380 = vtanh.f32 %v648_v18 }
 0x170   :  { %v1371_v43 = vpop.eup %1370  ;;  %930 = vst [vmem:[#allocation8 + $0xc0] sm:$0xff] %v898_v21 }
 0x171   :  { %v1373_v44 = vpop.eup %1372  ;;  %v901_v45 = vmul.f32 %v1371_v43, %v852_v37 }
 0x172   :  { %v900_v48 = vmul.f32 %v1373_v44, %v847_v39 }
 0x173   :  { %933 = vst [vmem:[#allocation8 + $0xd8] sm:$0xff] %v901_v45 }
 0x174   :  { %v1375_v49 = vpop.eup %1374  ;;  %932 = vst [vmem:[#allocation8 + $0xd0] sm:$0xff] %v900_v48 }
 0x175   :  { %v1377_v36 = vpop.eup %1376  ;;  %v903_v50 = vmul.f32 %v1375_v49, %v862_v47 }
 0x176   :  { %v902_v51 = vmul.f32 %v1377_v36, %v857_v22 }
 0x177   :  { %935 = vst [vmem:[#allocation8 + $0xe8] sm:$0xff] %v903_v50 }
 0x178   :  { %v1379_v25 = vpop.eup %1378  ;;  %934 = vst [vmem:[#allocation8 + $0xe0] sm:$0xff] %v902_v51 }
 0x179   :  { %v1381_v42 = vpop.eup %1380  ;;  %v905_v56 = vmul.f32 %v1379_v25, %v872_v52 }
 0x17a   :  { %v904_v57 = vmul.f32 %v1381_v42, %v867_v53 }
 0x17b   :  { %937 = vst [vmem:[#allocation8 + $0xf8] sm:$0xff] %v905_v56 }
 0x17c   :  { %936 = vst [vmem:[#allocation8 + $0xf0] sm:$0xff] %v904_v57 }
 0x17d   :  { %1459 = shalt.err (!%p1456_p0)
}
 0x17e   :  { %s1460_s17 = scalar_lea.hbm %s1871_s6, 4096 }
 0x17f   :  { %p1461_p1 = scmp.ne.s32.totalorder %s1871_s6, %s1460_s17  ;;  %p1464_p2 = scmp.lt.u32.totalorder %s1460_s17, %s1871_s6 }
 0x181   :  { %p1466_p3 = pnand %p1464_p2, %p1461_p1 }
 0x183   :  { %1469 = shalt.err (!%p1466_p3)
}
 0x184   :  { %949 = dma.vmem_to_hbm [thread:$0]  %s944_s4, 4096, %s1871_s6, [#allocation4], %s1478_s9, %s1478_s9, %s1479_s10  }
 0x185   :  { %1474 = dma.done.wait [#allocation4], 4096  }
 0x186   :  { %1475 = vsyncadd [#allocation4], 4294963200 }
 0x187   :  { %953 = vsyncpa [#allocation3], 1 }
 0x188   :  { %954 = vsyncpa [#allocation6], 1 }
 0x189   :  { %955 = vsyncpa [#allocation4], 1 }

</bundles_post_ra>
